<compile_context>
chip_gen: v5e
topology: v5e:2x2
jax: 0.10.0
libtpu: 0.0.40
codegen_flags: <defaults>
</compile_context>

<pallas_src>
import functools

import jax
import jax.numpy as jnp
from jax import lax
from jax.experimental import pallas as pl
from jax.experimental.pallas import tpu as pltpu


def _embed_kernel(x_ref, w_ref, b_ref, o_ref):
    # (rows, p*L) . (p*d_model, p*L), contracting the last dims -> (rows, p*d_model)
    acc = lax.dot_general(
        x_ref[...], w_ref[...],
        dimension_numbers=(((1,), (1,)), ((), ())),
        preferred_element_type=jnp.float32,
    )
    # f32 bias-add (VPU) + f32 tanh (EUP), then cast to the requested output dtype.
    o_ref[...] = jnp.tanh(acc + b_ref[...]).astype(o_ref.dtype)


def pack_embedding_params(weight, bias):
    """Precompute the block-diagonal (lane-dense) weight/bias once per parameter set.

    weight: (d_model, L) [nn.Linear layout]; bias: (d_model,).
    Returns (w_pk, b_pk, p) with w_pk: (p*d_model, p*L), b_pk: (1, p*d_model) f32.
    """
    d_model, _ = weight.shape
    p = 128 // d_model if (d_model < 128 and 128 % d_model == 0) else 1
    # NOTE: p == 1 (d_model >= 128 or not dividing 128) is still correct but the
    # output stores become masked partial-lane writes -- a known performance cliff.
    w_pk = jnp.kron(jnp.eye(p, dtype=weight.dtype), weight)            # (p*d_model, p*L)
    b_pk = jnp.tile(bias.astype(jnp.float32), p).reshape(1, p * d_model)
    return w_pk, b_pk, p


def _choose_block(R, p, tm):
    """Pick packed-rows-per-block and grid size.  R = total packed rows, tm is the
    target tile size in ORIGINAL (unpacked) rows."""
    target = max(8, ((tm // p) // 8) * 8)
    if R <= 8:
        return R, 1                                   # single full-array block
    # Force >= 2 grid steps so the 'parallel' axis can shard across v7x's 2 TCs.
    half = pl.cdiv(pl.cdiv(R, 2), 8) * 8
    block_rows = min(target, half)
    return block_rows, pl.cdiv(R, block_rows)


def sensor_data_embedding_packed(x, w_pk, b_pk, p, *, tm=8192, out_dtype=None):
    """tanh(Linear(win_size, d_model)) applied row-wise: (B, N, L) -> (B, N, d_model)."""
    B, N, L = x.shape
    d_model = w_pk.shape[0] // p
    assert w_pk.shape == (p * d_model, p * L), "packed weight/window size mismatch"
    out_dtype = out_dtype or x.dtype
    M = B * N

    x2d = x.reshape(M, L)
    # Pad only to a multiple of p (<= p-1 rows, usually zero) so the packed reshape
    # is legal.  No full-tile padding: the ragged final grid block is left to Pallas.
    Mp = pl.cdiv(M, p) * p
    if Mp != M:
        x2d = jnp.pad(x2d, ((0, Mp - M), (0, 0)))
    R = Mp // p
    x_pk = x2d.reshape(R, p * L)                       # contiguous reshape: no copy

    block_rows, grid = _choose_block(R, p, tm)

    cost = pl.CostEstimate(                            # true, non-kron-inflated figures
        flops=2 * M * L * d_model,
        transcendentals=M * d_model,
        bytes_accessed=(x_pk.size * x_pk.dtype.itemsize
                        + w_pk.size * w_pk.dtype.itemsize
                        + b_pk.size * b_pk.dtype.itemsize
                        + M * d_model * jnp.dtype(out_dtype).itemsize),
    )

    out_pk = pl.pallas_call(
        _embed_kernel,
        out_shape=jax.ShapeDtypeStruct((R, p * d_model), out_dtype),
        grid_spec=pltpu.PrefetchScalarGridSpec(
            num_scalar_prefetch=0,
            grid=(grid,),
            in_specs=[
                # Streamed x tile.  (If an xprof trace still shows exposed input DMA
                # on v6e, add pipeline_mode=pl.Buffered(3) here.)
                pl.BlockSpec((block_rows, p * L), lambda i: (i, 0)),
                pl.BlockSpec((p * d_model, p * L), lambda i: (0, 0)),   # resident weight
                pl.BlockSpec((1, p * d_model), lambda i: (0, 0)),       # resident bias
            ],
            out_specs=pl.BlockSpec((block_rows, p * d_model), lambda i: (i, 0)),
        ),
        compiler_params=pltpu.CompilerParams(
            dimension_semantics=("parallel",),
        ),
        cost_estimate=cost,
    )(x_pk, w_pk, b_pk)

    # (R, p*d_model) and (Mp, d_model) are byte-identical row-major layouts, so this
    # reshape is free; drop the (<= p-1) pad rows.  dropout(p=0.0) is the identity.
    return out_pk.reshape(Mp, d_model)[:M].reshape(B, N, d_model)


def make_sensor_data_embedding(weight, bias, *, tm=8192, out_dtype=None):
    """Factory: packs weight/bias ONCE (hoisted out of the hot path) and returns the
    forward fn.  For bf16 input traffic, pass bf16 x/weight from the upstream
    producer instead of casting here (a wrapper-side cast adds an HBM round trip)."""
    w_pk, b_pk, p = pack_embedding_params(weight, bias)
    return functools.partial(sensor_data_embedding_packed, w_pk=w_pk, b_pk=b_pk, p=p,
                             tm=tm, out_dtype=out_dtype)


def sensor_data_embedding(x, weight, bias, *, tm=8192, out_dtype=None):
    """One-shot convenience wrapper (re-packs the params each call; prefer the factory)."""
    w_pk, b_pk, p = pack_embedding_params(weight, bias)
    return sensor_data_embedding_packed(x, w_pk, b_pk, p, tm=tm, out_dtype=out_dtype)


if __name__ == "__main__":
    # Small shapes consistent with the module (embed='linear', win_size == L).
    B, N = 2, 4
    L = 128          # win_size
    d_model = 32

    key = jax.random.PRNGKey(0)
    kx, kw, kb = jax.random.split(key, 3)

    x = jax.random.normal(kx, (B, N, L), dtype=jnp.float32)

    # Deterministic nn.Linear(win_size, d_model)-style init: U(-1/sqrt(L), 1/sqrt(L)).
    bound = 1.0 / jnp.sqrt(jnp.float32(L))
    weight = jax.random.uniform(kw, (d_model, L), jnp.float32, -bound, bound)
    bias = jax.random.uniform(kb, (d_model,), jnp.float32, -bound, bound)

    embed = make_sensor_data_embedding(weight, bias)   # packs kron(I_p, W) once

    out = jax.block_until_ready(embed(x))
    ref = jnp.tanh(x.reshape(B * N, L) @ weight.T + bias).reshape(B, N, d_model)
    assert out.shape == (B, N, d_model)
    assert jnp.allclose(out, ref, atol=1e-5, rtol=1e-5)

    # Second check: multi-step 'parallel' grid with a ragged final block and NO
    # wrapper-side full-array pad (M = 600 rows, small tile to force 3 grid steps).
    B2, N2 = 2, 300
    x2 = jax.random.normal(kx, (B2, N2, L), dtype=jnp.float32)
    embed_small_tile = make_sensor_data_embedding(weight, bias, tm=256)
    out2 = jax.block_until_ready(embed_small_tile(x2))
    ref2 = jnp.tanh(x2.reshape(B2 * N2, L) @ weight.T + bias).reshape(B2, N2, d_model)
    assert jnp.allclose(out2, ref2, atol=1e-5, rtol=1e-5)

    print("KERNEL_OK")
</pallas_src>

<mosaic_0001>
module attributes {stable_mosaic.version = 11 : i64} {
  func.func @_embed_kernel(%arg0: i32, %arg1: memref<2x512xf32, #tpu.memory_space<vmem>>, %arg2: memref<128x512xf32, #tpu.memory_space<vmem>>, %arg3: memref<1x128xf32, #tpu.memory_space<vmem>>, %arg4: memref<2x128xf32, #tpu.memory_space<vmem>>) attributes {dimension_semantics = [#tpu.dimension_semantics<parallel>], iteration_bounds = array<i64: 1>, scalar_prefetch = 0 : i64, scratch_operands = 0 : i64, tpu.core_type = #tpu.core_type<tc>, window_params = [{transform_indices = @transform_0, window_bounds = array<i64: 2, 512>}, {pipeline_mode = #tpu.pipeline_mode<synchronous>, transform_indices = @transform_1, window_bounds = array<i64: 128, 512>}, {pipeline_mode = #tpu.pipeline_mode<synchronous>, transform_indices = @transform_2, window_bounds = array<i64: 1, 128>}, {transform_indices = @transform_3, window_bounds = array<i64: 2, 128>}]} {
    %c0 = arith.constant 0 : index
    %c0_0 = arith.constant 0 : index
    %0 = vector.load %arg1[%c0, %c0_0] : memref<2x512xf32, #tpu.memory_space<vmem>>, vector<2x512xf32>
    %c0_1 = arith.constant 0 : index
    %c0_2 = arith.constant 0 : index
    %1 = vector.load %arg2[%c0_1, %c0_2] : memref<128x512xf32, #tpu.memory_space<vmem>>, vector<128x512xf32>
    %cst = arith.constant dense<0.000000e+00> : vector<2x128xf32>
    %2 = tpu.matmul %0, %1, %cst {dimension_numbers = #tpu.dot_dimension_numbers<[1], [1], [0], [0], [0, 0, 1, 0], [], []>} : vector<2x512xf32>, vector<128x512xf32>, vector<2x128xf32> -> vector<2x128xf32>
    %c0_3 = arith.constant 0 : index
    %c0_4 = arith.constant 0 : index
    %3 = vector.load %arg3[%c0_3, %c0_4] : memref<1x128xf32, #tpu.memory_space<vmem>>, vector<1x128xf32>
    %4 = vector.broadcast %3 : vector<1x128xf32> to vector<2x128xf32>
    %5 = arith.addf %2, %4 : vector<2x128xf32>
    %6 = math.tanh %5 : vector<2x128xf32>
    %c0_5 = arith.constant 0 : index
    %c0_6 = arith.constant 0 : index
    %7 = vector.load %arg4[%c0_5, %c0_6] : memref<2x128xf32, #tpu.memory_space<vmem>>, vector<2x128xf32>
    tpu.vector_store %arg4[%c0_5, %c0_6], %6 {strides = array<i32>} : memref<2x128xf32, #tpu.memory_space<vmem>>, vector<2x128xf32>,
    return
  }
  func.func @transform_0(%arg0: i32) -> (i32, i32) {
    %c0_i32 = arith.constant 0 : i32
    %c0_i32_0 = arith.constant 0 : i32
    return %arg0, %c0_i32 : i32, i32
  }
  func.func @transform_1(%arg0: i32) -> (i32, i32) {
    %c0_i32 = arith.constant 0 : i32
    %c0_i32_0 = arith.constant 0 : i32
    %c0_i32_1 = arith.constant 0 : i32
    return %c0_i32, %c0_i32_0 : i32, i32
  }
  func.func @transform_2(%arg0: i32) -> (i32, i32) {
    %c0_i32 = arith.constant 0 : i32
    %c0_i32_0 = arith.constant 0 : i32
    %c0_i32_1 = arith.constant 0 : i32
    return %c0_i32, %c0_i32_0 : i32, i32
  }
  func.func @transform_3(%arg0: i32) -> (i32, i32) {
    %c0_i32 = arith.constant 0 : i32
    %c0_i32_0 = arith.constant 0 : i32
    return %arg0, %c0_i32 : i32, i32
  }
}

</mosaic_0001>

<bundles_post_ra>
// kernel: tpu_custom_call.1
= control target key start
LH: loop header
LB: loop body
LE: loop exit
PB: predicated region body
PF: predicated region fallthrough
CT: control target
= control target key end

     0   :  { %8 = vsyncpa [#allocation3], 0  ;;  %s347_s0 = inlined_call_operand.hbm [shape: f32[2,512], index: 0, kind: input, shape index: {}]   ;;  %s348_s1 = inlined_call_operand.hbm [shape: f32[128,512], index: 1, kind: input, shape index: {}]   ;;  %s349_s2 = inlined_call_operand.vmem [shape: f32[1,128], index: 2, kind: input, shape index: {}]   ;;  %s350_s3 = inlined_call_operand.hbm [shape: f32[2,128], index: 3, kind: output, shape index: {}]  }
   0x1   :  { %9 = vsyncpa [#allocation6], 0 }
   0x2   :  { %10 = vsyncpa [#allocation4], 0  ;;  %s16_s14 = sshll.u32 %s347_s0, 4  ;;  %s310_s15 = smov [#allocation2]   ;;  %s17_s14 = int_to_ptr.hbm [resolvable:$true] %s16_s14 }
   0x3   :  { %s18_s16 = sshll.u32 %s310_s15, 4  ;;  %s26_s19 = sshll.u32 %s348_s1, 4  ;;  %s19_s16 = int_to_ptr.vmem [resolvable:$true] %s18_s16  ;;  %s27_s19 = int_to_ptr.hbm [resolvable:$true] %s26_s19 }
   0x4   :  { %21 = dma.hbm_to_vmem [thread:$0]  %s17_s14, 128, %s19_s16, [#allocation3]  }
   0x5   :  { %s311_s20 = smov [#allocation5]   ;;  %s312_s22 = smov 512  }
   0x6   :  { %s28_s21 = sshll.u32 %s311_s20, 4  ;;  %s313_s23 = smov 32   ;;  %s29_s21 = int_to_ptr.vmem [resolvable:$true] %s28_s21 }
   0x7   :  { %34 = dma.hbm_to_vmem [thread:$0]  %s27_s19, 8192, %s29_s21, [#allocation6], %s312_s22, %s312_s22, %s313_s23  }
   0x8   :  { %304 = dma.done.wait [#allocation3], 128  }
   0x9   :  { %305 = vsyncadd [#allocation3], 4294967168 }
   0xa   :  { %306 = dma.done.wait [#allocation6], 8192  }
   0xb   :  { %307 = vsyncadd [#allocation6], 4294959104  ;;  %v108_v0 = vld [vmem:[#allocation5 + $0x1f0] sm:$0xff]  ;;  %v106_v1 = vld [vmem:[#allocation5 + $0x1e0] sm:$0xff]  ;;  %s314_s24 = smov [#allocation7]   ;;  %s213_s28 = sshll.u32 %s350_s3, 4  ;;  %s214_s28 = int_to_ptr.hbm [resolvable:$true] %s213_s28 }
   0xc   :  { %v109_v2 = vld [vmem:[#allocation5 + $0x1f8] sm:$0xff]  ;;  %164 = vmatpush.xpose.msra.mxu2 %v108_v0  ;;  %124 = vmatpush.xpose.msra.mxu0 %v106_v1  ;;  %v107_v3 = vld [vmem:[#allocation5 + $0x1e8] sm:$0xff]  ;;  %v104_v4 = vld [vmem:[#allocation5 + $0x1d0] sm:$0xff]  ;;  %s211_s25 = sshll.u32 %s314_s24, 4  ;;  %s212_s25 = int_to_ptr.vmem [resolvable:$true] %s211_s25 }
   0xd   :  { %184 = vmatpush.xpose.msra.mxu3 %v109_v2  ;;  %144 = vmatpush.xpose.msra.mxu1 %v107_v3  ;;  %v102_v5 = vld [vmem:[#allocation5 + $0x1c0] sm:$0xff]  ;;  %v105_v6 = vld [vmem:[#allocation5 + $0x1d8] sm:$0xff]  ;;  %v103_v7 = vld [vmem:[#allocation5 + $0x1c8] sm:$0xff] }
   0xe   :  { %v100_v8 = vld [vmem:[#allocation5 + $0x1b0] sm:$0xff]  ;;  %v98_v9 = vld [vmem:[#allocation5 + $0x1a0] sm:$0xff]  ;;  %v101_v10 = vld [vmem:[#allocation5 + $0x1b8] sm:$0xff] }
   0xf   :  { %v99_v11 = vld [vmem:[#allocation5 + $0x1a8] sm:$0xff]  ;;  %v96_v12 = vld [vmem:[#allocation5 + $0x190] sm:$0xff]  ;;  %v94_v13 = vld [vmem:[#allocation5 + $0x180] sm:$0xff] }
  0x10   :  { %165 = vmatpush.xpose.msra.mxu2 %v104_v4  ;;  %125 = vmatpush.xpose.msra.mxu0 %v102_v5  ;;  %v97_v14 = vld [vmem:[#allocation5 + $0x198] sm:$0xff]  ;;  %v95_v15 = vld [vmem:[#allocation5 + $0x188] sm:$0xff]  ;;  %v92_v16 = vld [vmem:[#allocation5 + $0x170] sm:$0xff] }
  0x11   :  { %185 = vmatpush.xpose.msra.mxu3 %v105_v6  ;;  %145 = vmatpush.xpose.msra.mxu1 %v103_v7  ;;  %v90_v17 = vld [vmem:[#allocation5 + $0x160] sm:$0xff]  ;;  %v93_v18 = vld [vmem:[#allocation5 + $0x178] sm:$0xff]  ;;  %v91_v19 = vld [vmem:[#allocation5 + $0x168] sm:$0xff] }
  0x12   :  { %v88_v20 = vld [vmem:[#allocation5 + $0x150] sm:$0xff]  ;;  %v86_v21 = vld [vmem:[#allocation5 + $0x140] sm:$0xff]  ;;  %v89_v22 = vld [vmem:[#allocation5 + $0x158] sm:$0xff] }
  0x13   :  { %v87_v23 = vld [vmem:[#allocation5 + $0x148] sm:$0xff]  ;;  %v84_v24 = vld [vmem:[#allocation5 + $0x130] sm:$0xff]  ;;  %v82_v25 = vld [vmem:[#allocation5 + $0x120] sm:$0xff] }
  0x14   :  { %166 = vmatpush.xpose.msra.mxu2 %v100_v8  ;;  %126 = vmatpush.xpose.msra.mxu0 %v98_v9  ;;  %v85_v26 = vld [vmem:[#allocation5 + $0x138] sm:$0xff]  ;;  %v83_v27 = vld [vmem:[#allocation5 + $0x128] sm:$0xff]  ;;  %v80_v29 = vld [vmem:[#allocation5 + $0x110] sm:$0xff] }
  0x15   :  { %186 = vmatpush.xpose.msra.mxu3 %v101_v10  ;;  %146 = vmatpush.xpose.msra.mxu1 %v99_v11  ;;  %v45_v28 = vld [vmem:[#allocation2] sm:$0xff]  ;;  %v78_v30 = vld [vmem:[#allocation5 + $0x100] sm:$0xff]  ;;  %v79_v32 = vld [vmem:[#allocation5 + $0x108] sm:$0xff] }
  0x16   :  { %115 = vst [vmem:[#allocation1] ss:$4 sm:$0xff] %v45_v28  ;;  %v81_v31 = vld [vmem:[#allocation5 + $0x118] sm:$0xff]  ;;  %v76_v33 = vld [vmem:[#allocation5 + $0xf0] sm:$0xff]  ;;  %v74_v34 = vld [vmem:[#allocation5 + $0xe0] sm:$0xff] }
  0x17   :  { %v77_v35 = vld [vmem:[#allocation5 + $0xf8] sm:$0xff]  ;;  %v75_v36 = vld [vmem:[#allocation5 + $0xe8] sm:$0xff]  ;;  %v72_v37 = vld [vmem:[#allocation5 + $0xd0] sm:$0xff] }
  0x18   :  { %167 = vmatpush.xpose.msra.mxu2 %v96_v12  ;;  %127 = vmatpush.xpose.msra.mxu0 %v94_v13  ;;  %v70_v38 = vld [vmem:[#allocation5 + $0xc0] sm:$0xff]  ;;  %v73_v39 = vld [vmem:[#allocation5 + $0xd8] sm:$0xff]  ;;  %v71_v40 = vld [vmem:[#allocation5 + $0xc8] sm:$0xff] }
  0x19   :  { %187 = vmatpush.xpose.msra.mxu3 %v97_v14  ;;  %147 = vmatpush.xpose.msra.mxu1 %v95_v15  ;;  %v68_v41 = vld [vmem:[#allocation5 + $0xb0] sm:$0xff]  ;;  %v66_v42 = vld [vmem:[#allocation5 + $0xa0] sm:$0xff]  ;;  %v69_v43 = vld [vmem:[#allocation5 + $0xb8] sm:$0xff] }
  0x1a   :  { %v67_v44 = vld [vmem:[#allocation5 + $0xa8] sm:$0xff]  ;;  %v64_v45 = vld [vmem:[#allocation5 + $0x90] sm:$0xff]  ;;  %v62_v46 = vld [vmem:[#allocation5 + $0x80] sm:$0xff] }
  0x1b   :  { %v65_v47 = vld [vmem:[#allocation5 + $0x98] sm:$0xff]  ;;  %v63_v48 = vld [vmem:[#allocation5 + $0x88] sm:$0xff]  ;;  %v60_v49 = vld [vmem:[#allocation5 + $0x70] sm:$0xff] }
  0x1c   :  { %168 = vmatpush.xpose.msra.mxu2 %v92_v16  ;;  %128 = vmatpush.xpose.msra.mxu0 %v90_v17  ;;  %v58_v50 = vld [vmem:[#allocation5 + $0x60] sm:$0xff]  ;;  %v61_v51 = vld [vmem:[#allocation5 + $0x78] sm:$0xff]  ;;  %v59_v52 = vld [vmem:[#allocation5 + $0x68] sm:$0xff] }
  0x1d   :  { %188 = vmatpush.xpose.msra.mxu3 %v93_v18  ;;  %148 = vmatpush.xpose.msra.mxu1 %v91_v19  ;;  %v56_v53 = vld [vmem:[#allocation5 + $0x50] sm:$0xff]  ;;  %v54_v54 = vld [vmem:[#allocation5 + $0x40] sm:$0xff]  ;;  %v57_v55 = vld [vmem:[#allocation5 + $0x58] sm:$0xff] }
  0x1e   :  { %v55_v56 = vld [vmem:[#allocation5 + $0x48] sm:$0xff]  ;;  %v52_v57 = vld [vmem:[#allocation5 + $0x30] sm:$0xff]  ;;  %v50_v58 = vld [vmem:[#allocation5 + $0x20] sm:$0xff] }
  0x1f   :  { %v53_v59 = vld [vmem:[#allocation5 + $0x38] sm:$0xff]  ;;  %v51_v60 = vld [vmem:[#allocation5 + $0x28] sm:$0xff]  ;;  %v48_v61 = vld [vmem:[#allocation5 + $0x10] sm:$0xff] }
  0x20   :  { %169 = vmatpush.xpose.msra.mxu2 %v88_v20  ;;  %129 = vmatpush.xpose.msra.mxu0 %v86_v21  ;;  %v46_v62 = vld [vmem:[#allocation5] sm:$0xff]  ;;  %v49_v63 = vld [vmem:[#allocation5 + $0x18] sm:$0xff]  ;;  %v47_v0 = vld [vmem:[#allocation5 + $0x8] sm:$0xff] }
  0x21   :  { %189 = vmatpush.xpose.msra.mxu3 %v89_v22  ;;  %149 = vmatpush.xpose.msra.mxu1 %v87_v23  ;;  %v118_v1 = vld.sshfl [vmem:[#allocation1 + $0x10] sm:$0xff pattern:$0x73625140]  ;;  %v116_v2 = vld.sshfl [vmem:[#allocation1] sm:$0xff pattern:$0x73625140] }
  0x22   :  { %v119_v3 = vld.sshfl [vmem:[#allocation1 + $0x18] sm:$0xff pattern:$0x73625140]  ;;  %v117_v4 = vld.sshfl [vmem:[#allocation1 + $0x8] sm:$0xff pattern:$0x73625140] }
  0x23   :  { %v229_v5 = vld [vmem:[%s349_s2] ss:$0 sm:$0xff] }
  0x24   :  { %170 = vmatpush.xpose.msra.mxu2 %v84_v24  ;;  %130 = vmatpush.xpose.msra.mxu0 %v82_v25 }
  0x25   :  { %190 = vmatpush.xpose.msra.mxu3 %v85_v26  ;;  %150 = vmatpush.xpose.msra.mxu1 %v83_v27 }
  0x28   :  { %171 = vmatpush.xpose.msra.mxu2 %v80_v29  ;;  %131 = vmatpush.xpose.msra.mxu0 %v78_v30 }
  0x29   :  { %191 = vmatpush.xpose.msra.mxu3 %v81_v31  ;;  %151 = vmatpush.xpose.msra.mxu1 %v79_v32 }
  0x2c   :  { %172 = vmatpush.xpose.msra.mxu2 %v76_v33  ;;  %132 = vmatpush.xpose.msra.mxu0 %v74_v34 }
  0x2d   :  { %192 = vmatpush.xpose.msra.mxu3 %v77_v35  ;;  %152 = vmatpush.xpose.msra.mxu1 %v75_v36 }
  0x30   :  { %173 = vmatpush.xpose.msra.mxu2 %v72_v37  ;;  %133 = vmatpush.xpose.msra.mxu0 %v70_v38 }
  0x31   :  { %193 = vmatpush.xpose.msra.mxu3 %v73_v39  ;;  %153 = vmatpush.xpose.msra.mxu1 %v71_v40 }
  0x34   :  { %174 = vmatpush.xpose.msra.mxu2 %v68_v41  ;;  %134 = vmatpush.xpose.msra.mxu0 %v66_v42 }
  0x35   :  { %194 = vmatpush.xpose.msra.mxu3 %v69_v43  ;;  %154 = vmatpush.xpose.msra.mxu1 %v67_v44 }
  0x38   :  { %175 = vmatpush.xpose.msra.mxu2 %v64_v45  ;;  %135 = vmatpush.xpose.msra.mxu0 %v62_v46 }
  0x39   :  { %195 = vmatpush.xpose.msra.mxu3 %v65_v47  ;;  %155 = vmatpush.xpose.msra.mxu1 %v63_v48 }
  0x3c   :  { %176 = vmatpush.xpose.msra.mxu2 %v60_v49  ;;  %136 = vmatpush.xpose.msra.mxu0 %v58_v50 }
  0x3d   :  { %196 = vmatpush.xpose.msra.mxu3 %v61_v51  ;;  %156 = vmatpush.xpose.msra.mxu1 %v59_v52 }
  0x40   :  { %177 = vmatpush.xpose.msra.mxu2 %v56_v53  ;;  %137 = vmatpush.xpose.msra.mxu0 %v54_v54 }
  0x41   :  { %197 = vmatpush.xpose.msra.mxu3 %v57_v55  ;;  %157 = vmatpush.xpose.msra.mxu1 %v55_v56 }
  0x44   :  { %178 = vmatpush.xpose.msra.mxu2 %v52_v57  ;;  %138 = vmatpush.xpose.msra.mxu0 %v50_v58 }
  0x45   :  { %198 = vmatpush.xpose.msra.mxu3 %v53_v59  ;;  %158 = vmatpush.xpose.msra.mxu1 %v51_v60 }
  0x48   :  { %179 = vmatpush.xpose.msra.mxu2 %v48_v61  ;;  %139 = vmatpush.xpose.msra.mxu0 %v46_v62 }
  0x49   :  { %199 = vmatpush.xpose.msra.mxu3 %v49_v63  ;;  %159 = vmatpush.xpose.msra.mxu1 %v47_v0 }
  0x4b   :  { %180 = vmatmul.f32.vlgmr.msra.gmra.mxu2 %v118_v1  ;;  %140 = vmatmul.f32.vlgmr.msra.gmra.mxu0 %v116_v2 }
  0x4c   :  { %200 = vmatmul.f32.vlgmr.msra.gmra.mxu3 %v119_v3  ;;  %160 = vmatmul.f32.vlgmr.msra.gmra.mxu1 %v117_v4 }
  0xc8   :  { %v141_v6 = vpop.f32.mrf.mxu0 }
  0xc9   :  { %v142_v7 = vadd.f32 %v229_v5, %v141_v6  ;;  %v161_v8 = vpop.f32.mrf.mxu1 }
  0xcb   :  { %v162_v9 = vadd.f32 %v161_v8, %v142_v7 }
  0xce   :  { %v181_v10 = vpop.f32.mrf.mxu2 }
  0xcf   :  { %v182_v11 = vadd.f32 %v181_v10, %v162_v9  ;;  %v201_v12 = vpop.f32.mrf.mxu3 }
  0xd1   :  { %v202_v13 = vadd.f32 %v201_v12, %v182_v11 }
  0xd3   :  { %230 = vtanh.f32 %v202_v13 }
  0xd9   :  { %v231_v14 = vpop.eup %230 }
  0xda   :  { %205 = vst [vmem:[#allocation7] sm:$0x3] %v231_v14 }
  0xdb   :  { %216 = dma.vmem_to_hbm [thread:$0]  %s212_s25, 32, %s214_s28, [#allocation4]  }
  0xdc   :  { %308 = dma.done.wait [#allocation4], 32  }
  0xdd   :  { %309 = vsyncadd [#allocation4], 4294967264 }
  0xde   :  { %221 = vsyncpa [#allocation3], 1 }
  0xdf   :  { %222 = vsyncpa [#allocation6], 1 }
  0xe0   :  { %223 = vsyncpa [#allocation4], 1 }

</bundles_post_ra>
